<compile_context>
chip_gen: v7x
topology: tpu7x:2x2x1
jax: 0.10.0
libtpu: 0.0.40
codegen_flags: <defaults>
</compile_context>

<pallas_src>
import math
from functools import partial

import jax
import jax.numpy as jnp
from jax.experimental import pallas as pl
from jax.experimental.pallas import tpu as pltpu


# ----------------------------------------------------------------------------
# Constant buffer (== PositionalEncoding.__init__)
# ----------------------------------------------------------------------------
def build_positional_encoding_table(d_model, max_len=5003, dtype=jnp.float32):
    """Sinusoidal table: sin on even columns, cos on odd columns."""
    position = jnp.arange(max_len, dtype=jnp.float32)[:, None]            # (L, 1)
    div_term = jnp.exp(jnp.arange(0, d_model, 2, dtype=jnp.float32)
                       * (-math.log(10000.0) / d_model))                  # (ceil(d/2),)
    angles = position * div_term                                          # (L, ceil(d/2))
    pe = jnp.zeros((max_len, d_model), jnp.float32)
    pe = pe.at[:, 0::2].set(jnp.sin(angles))
    # Slice cos to floor(d/2) columns so odd d_model also works (the torch code
    # assumes even d_model; this is a strict superset of its behavior).
    pe = pe.at[:, 1::2].set(jnp.cos(angles)[:, : d_model // 2])
    return pe.astype(dtype)


# ----------------------------------------------------------------------------
# Pallas kernel: out[b, s, :] = x[b, s, :] + pe[s, :]
# ----------------------------------------------------------------------------
def _add_pe_kernel(x_ref, pe_ref, o_ref):
    # x_ref: (bb, S, D), pe_ref: (S, D) -> broadcast over the batch tile.
    o_ref[...] = x_ref[...] + pe_ref[...][None, :, :]


def positional_encoding_forward(x, pe_table):
    """x: (B, S, d_model) float32; pe_table: (max_len, d_model). Returns x + pe."""
    B, S, D = x.shape
    max_len, d_model = pe_table.shape
    if D != d_model:
        raise ValueError(
            f"Input feature_dim ({D}) does not match PositionalEncoding "
            f"d_model ({d_model})")
    if S > max_len:
        raise ValueError(
            f"Input seq_len ({S}) exceeds PositionalEncoding max_len ({max_len})")

    # Constant slice of the constant table (folded by XLA; no extra kernel).
    pe = pe_table[:S, :]

    # One full-block call while it fits VMEM; only tile the batch axis beyond
    # that (keeps every launch lane-dense and minimizes grid-step overhead).
    itemsize = jnp.dtype(x.dtype).itemsize
    vmem_budget = 8 * 1024 * 1024            # conservative vs. scoped VMEM limit
    bb = B
    while bb > 1 and (2 * bb * S * D + S * D) * itemsize > vmem_budget:
        bb = max(1, bb // 2)
    grid = (pl.cdiv(B, bb),)

    return pl.pallas_call(
        _add_pe_kernel,
        out_shape=jax.ShapeDtypeStruct((B, S, D), x.dtype),
        grid_spec=pltpu.PrefetchScalarGridSpec(
            num_scalar_prefetch=0,
            grid=grid,
            in_specs=[
                pl.BlockSpec((bb, S, D), lambda b: (b, 0, 0)),   # x batch tile
                pl.BlockSpec((S, D), lambda b: (0, 0)),          # pe, resident
            ],
            out_specs=pl.BlockSpec((bb, S, D), lambda b: (b, 0, 0)),
        ),
        compiler_params=pltpu.CompilerParams(
            dimension_semantics=("parallel",)),   # megacore-shardable on v7x
    )(x, pe)


# ----------------------------------------------------------------------------
if __name__ == "__main__":
    B, S, D_MODEL = 2, 8, 128      # lane-dense d_model (multiple of 128)
    MAX_LEN = 5003                 # module default

    key = jax.random.PRNGKey(0)
    x = jax.random.normal(key, (B, S, D_MODEL), jnp.float32)
    pe_table = build_positional_encoding_table(D_MODEL, MAX_LEN)

    fwd = jax.jit(positional_encoding_forward)
    out = fwd(x, pe_table)
    jax.block_until_ready(out)

    # Reference check (plain JAX) — same math as the PyTorch forward.
    ref = x + pe_table[None, :S, :]
    assert out.shape == (B, S, D_MODEL)
    assert jnp.allclose(out, ref, atol=1e-6, rtol=1e-6)
    print("KERNEL_OK")
</pallas_src>

<mosaic_0001>
module attributes {stable_mosaic.version = 11 : i64} {
  func.func @_add_pe_kernel(%arg0: i32, %arg1: memref<2x8x128xf32, #tpu.memory_space<vmem>>, %arg2: memref<8x128xf32, #tpu.memory_space<vmem>>, %arg3: memref<2x8x128xf32, #tpu.memory_space<vmem>>) attributes {dimension_semantics = [#tpu.dimension_semantics<parallel>], iteration_bounds = array<i64: 1>, scalar_prefetch = 0 : i64, scratch_operands = 0 : i64, tpu.core_type = #tpu.core_type<tc>, window_params = [{transform_indices = @transform_0, window_bounds = array<i64: 2, 8, 128>}, {pipeline_mode = #tpu.pipeline_mode<synchronous>, transform_indices = @transform_1, window_bounds = array<i64: 8, 128>}, {transform_indices = @transform_2, window_bounds = array<i64: 2, 8, 128>}]} {
    %c0 = arith.constant 0 : index
    %c0_0 = arith.constant 0 : index
    %c0_1 = arith.constant 0 : index
    %0 = vector.load %arg1[%c0, %c0_0, %c0_1] : memref<2x8x128xf32, #tpu.memory_space<vmem>>, vector<2x8x128xf32>
    %c0_2 = arith.constant 0 : index
    %c0_3 = arith.constant 0 : index
    %1 = vector.load %arg2[%c0_2, %c0_3] : memref<8x128xf32, #tpu.memory_space<vmem>>, vector<8x128xf32>
    %2 = vector.shape_cast %1 : vector<8x128xf32> to vector<1x8x128xf32>
    %3 = vector.broadcast %2 : vector<1x8x128xf32> to vector<2x8x128xf32>
    %4 = arith.addf %0, %3 : vector<2x8x128xf32>
    %c0_4 = arith.constant 0 : index
    %c0_5 = arith.constant 0 : index
    %c0_6 = arith.constant 0 : index
    %5 = vector.load %arg3[%c0_4, %c0_5, %c0_6] : memref<2x8x128xf32, #tpu.memory_space<vmem>>, vector<2x8x128xf32>
    tpu.vector_store %arg3[%c0_4, %c0_5, %c0_6], %4 {strides = array<i32>} : memref<2x8x128xf32, #tpu.memory_space<vmem>>, vector<2x8x128xf32>,
    return
  }
  func.func @transform_0(%arg0: i32) -> (i32, i32, i32) {
    %c0_i32 = arith.constant 0 : i32
    %c0_i32_0 = arith.constant 0 : i32
    %c0_i32_1 = arith.constant 0 : i32
    return %arg0, %c0_i32, %c0_i32_0 : i32, i32, i32
  }
  func.func @transform_1(%arg0: i32) -> (i32, i32) {
    %c0_i32 = arith.constant 0 : i32
    %c0_i32_0 = arith.constant 0 : i32
    %c0_i32_1 = arith.constant 0 : i32
    return %c0_i32, %c0_i32_0 : i32, i32
  }
  func.func @transform_2(%arg0: i32) -> (i32, i32, i32) {
    %c0_i32 = arith.constant 0 : i32
    %c0_i32_0 = arith.constant 0 : i32
    %c0_i32_1 = arith.constant 0 : i32
    return %arg0, %c0_i32, %c0_i32_0 : i32, i32, i32
  }
}

</mosaic_0001>

<bundles_post_ra>
// kernel: positional_encoding_forward.1
= control target key start
LH: loop header
LB: loop body
LE: loop exit
PB: predicated region body
PF: predicated region fallthrough
CT: control target
= control target key end

     0   :  { %7 = vsyncpa [#allocation3], 0  ;;  %s154_s0 = inlined_call_operand.hbm [shape: f32[2,8,128], index: 0, kind: input, shape index: {}]   ;;  %s155_s1 = inlined_call_operand.vmem [shape: f32[8,128], index: 1, kind: input, shape index: {}]   ;;  %s156_s2 = inlined_call_operand.hbm [shape: f32[2,8,128], index: 2, kind: output, shape index: {}]  }
   0x1   :  { %8 = vsyncpa [#allocation4], 0  ;;  %s102_s9 = smov [#allocation2]   ;;  %s54_s13 = scalar_lea.hbm %s154_s0, 256 }
   0x2   :  { %s14_s10 = sshll.u32 %s102_s9, 4  ;;  %p55_p0 = scmp.ne.s32.totalorder %s154_s0, %s54_s13  ;;  %s15_s10 = int_to_ptr.vmem [resolvable:$true] %s14_s10 }
   0x3   :  { %p58_p1 = scmp.lt.u32.totalorder %s54_s13, %s154_s0 }
   0x5   :  { %p60_p2 = pnand %p58_p1, %p55_p0 }
   0x7   :  { %63 = shalt.err (!%p60_p2)
}
   0x8   :  { %s64_s18 = scalar_lea.vmem %s15_s10, 256  ;;  %p69_p4 = scmp.lt.s32.totalorder %s15_s10, %s15_s10 }
   0x9   :  { %p65_p3 = scmp.ne.s32.totalorder %s15_s10, %s64_s18  ;;  %p70_p5 = scmp.lt.s32.totalorder %s64_s18, %s64_s18 }
   0xb   :  { %p71_p6 = por %p70_p5, %p69_p4 }
   0xd   :  { %p72_p7 = pnand %p71_p6, %p65_p3 }
   0xf   :  { %75 = shalt.err (!%p72_p7)
}
  0x10   :  { %s103_s19 = smov 128   ;;  %s104_s20 = smov 8  }
  0x11   :  { %20 = dma.hbm_to_vmem [thread:$0]  %s154_s0, 256, %s15_s10, [#allocation3], %s103_s19, %s103_s19, %s104_s20  }
  0x12   :  { %98 = dma.done.wait [#allocation3], 256  }
  0x13   :  { %99 = vsyncadd [#allocation3], 4294967040  ;;  %s105_s23 = smov [#allocation5]   ;;  %v26_v0 = vld [vmem:[#allocation2] sm:$0xff]  ;;  %v27_v2 = vld [vmem:[#allocation2 + $0x8] sm:$0xff] }
  0x14   :  { %s38_s24 = sshll.u32 %s105_s23, 4  ;;  %v28_v1 = vld [vmem:[%s155_s1] sm:$0xff]  ;;  %s39_s24 = int_to_ptr.vmem [resolvable:$true] %s38_s24 }
  0x15   :  { %v29_v3 = vadd.f32 %v28_v1, %v26_v0  ;;  %v30_v4 = vadd.f32 %v28_v1, %v27_v2  ;;  %s76_s27 = scalar_lea.vmem %s39_s24, 256  ;;  %p81_p9 = scmp.lt.s32.totalorder %s39_s24, %s39_s24 }
  0x16   :  { %p77_p8 = scmp.ne.s32.totalorder %s39_s24, %s76_s27  ;;  %p82_p10 = scmp.lt.s32.totalorder %s76_s27, %s76_s27 }
  0x17   :  { %31 = vst [vmem:[#allocation5] sm:$0xff] %v29_v3  ;;  %32 = vst [vmem:[#allocation5 + $0x8] sm:$0xff] %v30_v4 }
  0x18   :  { %p83_p11 = por %p82_p10, %p81_p9 }
  0x1a   :  { %p84_p12 = pnand %p83_p11, %p77_p8 }
  0x1c   :  { %87 = shalt.err (!%p84_p12)
}
  0x1d   :  { %s88_s29 = scalar_lea.hbm %s156_s2, 256 }
  0x1e   :  { %p89_p13 = scmp.ne.s32.totalorder %s156_s2, %s88_s29  ;;  %p92_p0 = scmp.lt.u32.totalorder %s88_s29, %s156_s2 }
  0x20   :  { %p94_p1 = pnand %p92_p0, %p89_p13 }
  0x22   :  { %97 = shalt.err (!%p94_p1)
}
  0x23   :  { %44 = dma.vmem_to_hbm [thread:$0]  %s39_s24, 256, %s156_s2, [#allocation4], %s103_s19, %s103_s19, %s104_s20  }
  0x24   :  { %100 = dma.done.wait [#allocation4], 256  }
  0x25   :  { %101 = vsyncadd [#allocation4], 4294967040 }
  0x26   :  { %48 = vsyncpa [#allocation3], 1 }
  0x27   :  { %49 = vsyncpa [#allocation4], 1 }

</bundles_post_ra>
